<compile_context>
chip_gen: v7x
topology: tpu7x:2x2x1
jax: 0.10.0
libtpu: 0.0.40
codegen_flags: <defaults>
</compile_context>

<pallas_src>
import jax
import jax.numpy as jnp
from jax import lax
from jax.experimental import pallas as pl
from jax.experimental.pallas import tpu as pltpu


def _featuremap_kernel(w_ref, x_ref, o_ref):
    """One tile of the 1x1 conv: o[n, :, hw] = W_masked @ x[n, :, hw].

    w_ref: (Cout, Cin)       masked weight (same block every grid step -> resident)
    x_ref: (1, Cin, T_HW)    NCHW-native activation tile (lane axis = H*W)
    o_ref: (1, Cout, T_HW)   lane-dense output tile
    """
    x = x_ref[0]          # (Cin, T_HW)
    w = w_ref[...]        # (Cout, Cin)
    cin = x.shape[0]
    if cin <= 32:
        # Tiny contraction: skip the MXU, do broadcast-FMA on the VPU (exact f32).
        acc = w[:, 0:1] * x[0:1, :]                    # (Cout, T_HW)
        for c in range(1, cin):
            acc = acc + w[:, c:c + 1] * x[c:c + 1, :]
    else:
        acc = jnp.dot(w, x, preferred_element_type=jnp.float32,
                      precision=lax.Precision.HIGHEST)
    o_ref[0] = acc.astype(o_ref.dtype)


def feature_map_block(x_nchw, weight, mask, *, vmem_budget_bytes=16 << 20):
    """Pallas equivalent of FeatureMapBlock.forward.

    x_nchw : (N, Cin, H, W) float32
    weight : (Cout, Cin, 1, 1) float32   (nn.Conv2d weight, kernel_size=1, no bias)
    mask   : (Cout, Cin, 1, 1) float32   (tasks_masks[task_id])
    returns: (N, Cout, H, W) float32
    """
    N, Cin, H, W = x_nchw.shape
    Cout = weight.shape[0]
    HW = H * W

    # Fold the task mask into the weight once (outside the grid loop).
    w2d = (weight * mask).reshape(Cout, Cin)

    # NCHW-native: flatten H*W onto the lane axis. Pure reshape, no transpose.
    x3d = x_nchw.reshape(N, Cin, HW)

    # Lane-dense tiling over H*W: largest multiple of 128 dividing HW, capped so
    # the double-buffered in+out tiles fit comfortably in scoped VMEM.
    itemsize = jnp.dtype(x_nchw.dtype).itemsize
    bytes_per_hw = (Cin + Cout) * itemsize * 2          # x tile + o tile, double-buffered
    cap = max(128, (vmem_budget_bytes // max(bytes_per_hw, 1)) // 128 * 128)
    tile_hw = HW
    if HW % 128 == 0:
        cap = min(HW, cap)
        tile_hw = max(t for t in range(128, cap + 1, 128) if HW % t == 0)
    grid = (N, HW // tile_hw)

    cost = pl.CostEstimate(
        flops=2 * N * HW * Cin * Cout,
        transcendentals=0,
        bytes_accessed=itemsize * (N * Cin * HW + N * Cout * HW + Cin * Cout),
    )

    y3d = pl.pallas_call(
        _featuremap_kernel,
        out_shape=jax.ShapeDtypeStruct((N, Cout, HW), x_nchw.dtype),
        grid_spec=pltpu.PrefetchScalarGridSpec(
            num_scalar_prefetch=0,
            grid=grid,
            in_specs=[
                pl.BlockSpec((Cout, Cin), lambda n, t: (0, 0)),           # masked weight (resident)
                pl.BlockSpec((1, Cin, tile_hw), lambda n, t: (n, 0, t)),  # activation tile
            ],
            out_specs=pl.BlockSpec((1, Cout, tile_hw), lambda n, t: (n, 0, t)),
        ),
        compiler_params=pltpu.CompilerParams(
            dimension_semantics=("parallel", "parallel"),
        ),
        cost_estimate=cost,
    )(w2d, x3d)

    return y3d.reshape(N, Cout, H, W)


if __name__ == "__main__":
    key = jax.random.PRNGKey(0)
    kx, kw = jax.random.split(key)

    N, Cin, Cout, H, W = 2, 4, 8, 16, 16

    x = jax.random.normal(kx, (N, Cin, H, W), dtype=jnp.float32)
    # Deterministic synthetic init for nn.Conv2d(Cin, Cout, kernel_size=1, bias=False)
    weight = jax.random.normal(kw, (Cout, Cin, 1, 1), dtype=jnp.float32) * 0.1
    # conv_mask = torch.ones(output_channels, input_channels, 1, 1); task 0 mask
    mask = jnp.ones((Cout, Cin, 1, 1), dtype=jnp.float32)

    y = feature_map_block(x, weight, mask)
    jax.block_until_ready(y)

    # Reference: pure-JAX 1x1 conv (einsum over the channel dim), exact f32.
    y_ref = jnp.einsum("nchw,oc->nohw", x, (weight * mask)[:, :, 0, 0],
                       precision=lax.Precision.HIGHEST)
    assert y.shape == (N, Cout, H, W)
    assert jnp.allclose(y, y_ref, atol=1e-5), "mismatch vs reference"

    print("KERNEL_OK")
</pallas_src>

<mosaic_0001>
module attributes {stable_mosaic.version = 11 : i64} {
  func.func @_featuremap_kernel(%arg0: i32, %arg1: i32, %arg2: memref<8x4xf32, #tpu.memory_space<vmem>>, %arg3: memref<1x4x256xf32, #tpu.memory_space<vmem>>, %arg4: memref<1x8x256xf32, #tpu.memory_space<vmem>>) attributes {dimension_semantics = [#tpu.dimension_semantics<parallel>, #tpu.dimension_semantics<parallel>], iteration_bounds = array<i64: 2, 1>, scalar_prefetch = 0 : i64, scratch_operands = 0 : i64, tpu.core_type = #tpu.core_type<tc>, window_params = [{pipeline_mode = #tpu.pipeline_mode<synchronous>, transform_indices = @transform_0, window_bounds = array<i64: 8, 4>}, {transform_indices = @transform_1, window_bounds = array<i64: 1, 4, 256>}, {transform_indices = @transform_2, window_bounds = array<i64: 1, 8, 256>}]} {
    %c0 = arith.constant 0 : index
    %c0_0 = arith.constant 0 : index
    %c0_1 = arith.constant 0 : index
    %0 = vector.load %arg3[%c0, %c0_0, %c0_1] : memref<1x4x256xf32, #tpu.memory_space<vmem>>, vector<1x4x256xf32>
    %1 = vector.shape_cast %0 : vector<1x4x256xf32> to vector<4x256xf32>
    %c0_2 = arith.constant 0 : index
    %c0_3 = arith.constant 0 : index
    %2 = vector.load %arg2[%c0_2, %c0_3] : memref<8x4xf32, #tpu.memory_space<vmem>>, vector<8x4xf32>
    %3 = vector.extract_strided_slice %2 {offsets = [0, 0], sizes = [8, 1], strides = [1, 1]} : vector<8x4xf32> to vector<8x1xf32>
    %4 = vector.extract_strided_slice %1 {offsets = [0, 0], sizes = [1, 256], strides = [1, 1]} : vector<4x256xf32> to vector<1x256xf32>
    %5 = vector.broadcast %3 : vector<8x1xf32> to vector<8x256xf32>
    %6 = vector.broadcast %4 : vector<1x256xf32> to vector<8x256xf32>
    %7 = arith.mulf %5, %6 : vector<8x256xf32>
    %8 = vector.extract_strided_slice %2 {offsets = [0, 1], sizes = [8, 1], strides = [1, 1]} : vector<8x4xf32> to vector<8x1xf32>
    %9 = vector.extract_strided_slice %1 {offsets = [1, 0], sizes = [1, 256], strides = [1, 1]} : vector<4x256xf32> to vector<1x256xf32>
    %10 = vector.broadcast %8 : vector<8x1xf32> to vector<8x256xf32>
    %11 = vector.broadcast %9 : vector<1x256xf32> to vector<8x256xf32>
    %12 = arith.mulf %10, %11 : vector<8x256xf32>
    %13 = arith.addf %7, %12 : vector<8x256xf32>
    %14 = vector.extract_strided_slice %2 {offsets = [0, 2], sizes = [8, 1], strides = [1, 1]} : vector<8x4xf32> to vector<8x1xf32>
    %15 = vector.extract_strided_slice %1 {offsets = [2, 0], sizes = [1, 256], strides = [1, 1]} : vector<4x256xf32> to vector<1x256xf32>
    %16 = vector.broadcast %14 : vector<8x1xf32> to vector<8x256xf32>
    %17 = vector.broadcast %15 : vector<1x256xf32> to vector<8x256xf32>
    %18 = arith.mulf %16, %17 : vector<8x256xf32>
    %19 = arith.addf %13, %18 : vector<8x256xf32>
    %20 = vector.extract_strided_slice %2 {offsets = [0, 3], sizes = [8, 1], strides = [1, 1]} : vector<8x4xf32> to vector<8x1xf32>
    %21 = vector.extract_strided_slice %1 {offsets = [3, 0], sizes = [1, 256], strides = [1, 1]} : vector<4x256xf32> to vector<1x256xf32>
    %22 = vector.broadcast %20 : vector<8x1xf32> to vector<8x256xf32>
    %23 = vector.broadcast %21 : vector<1x256xf32> to vector<8x256xf32>
    %24 = arith.mulf %22, %23 : vector<8x256xf32>
    %25 = arith.addf %19, %24 : vector<8x256xf32>
    %c0_4 = arith.constant 0 : index
    %c0_5 = arith.constant 0 : index
    %c0_6 = arith.constant 0 : index
    %26 = vector.load %arg4[%c0_4, %c0_5, %c0_6] : memref<1x8x256xf32, #tpu.memory_space<vmem>>, vector<1x8x256xf32>
    %27 = vector.shape_cast %26 : vector<1x8x256xf32> to vector<8x256xf32>
    %28 = vector.shape_cast %25 : vector<8x256xf32> to vector<1x8x256xf32>
    tpu.vector_store %arg4[%c0_4, %c0_5, %c0_6], %28 {strides = array<i32>} : memref<1x8x256xf32, #tpu.memory_space<vmem>>, vector<1x8x256xf32>,
    return
  }
  func.func @transform_0(%arg0: i32, %arg1: i32) -> (i32, i32) {
    %c0_i32 = arith.constant 0 : i32
    %c0_i32_0 = arith.constant 0 : i32
    %c0_i32_1 = arith.constant 0 : i32
    return %c0_i32, %c0_i32_0 : i32, i32
  }
  func.func @transform_1(%arg0: i32, %arg1: i32) -> (i32, i32, i32) {
    %c0_i32 = arith.constant 0 : i32
    %c0_i32_0 = arith.constant 0 : i32
    return %arg0, %c0_i32, %arg1 : i32, i32, i32
  }
  func.func @transform_2(%arg0: i32, %arg1: i32) -> (i32, i32, i32) {
    %c0_i32 = arith.constant 0 : i32
    %c0_i32_0 = arith.constant 0 : i32
    return %arg0, %c0_i32, %arg1 : i32, i32, i32
  }
}

</mosaic_0001>

<bundles_post_ra>
// kernel: tpu_custom_call.1
= control target key start
LH: loop header
LB: loop body
LE: loop exit
PB: predicated region body
PF: predicated region fallthrough
CT: control target
= control target key end

     0   :  { %7 = vsyncpa [#allocation3], 0  ;;  %s788_s0 = inlined_call_operand.vmem [shape: f32[8,4], index: 0, kind: input, shape index: {}]   ;;  %s789_s1 = inlined_call_operand.hbm [shape: f32[2,4,256], index: 1, kind: input, shape index: {}]   ;;  %s790_s2 = inlined_call_operand.hbm [shape: f32[2,8,256], index: 2, kind: output, shape index: {}]  }
   0x1   :  { %9 = vsyncpa [#allocation3 + $0x1], 0 }
   0x2   :  { %10 = vsyncpa [#allocation4], 0 }
   0x3   :  { %12 = vsyncpa [#allocation4 + $0x1], 0  ;;  %s612_s9 = smov 0   ;;  %s614_s10 = smov 0  }
   0x4   :  { %s616_s11 = smov 0   ;;  %s618_s12 = smov 0  }
   0x5   :  { %s620_s13 = smov 0   ;;  %s622_s14 = smov 0  }
   0x6 LB: > { %s389_s15 = sadd.s32 4294967295, %s589_s14   ;;  %s390_s16 = sadd.s32 4294967294, %s589_s14   ;;  %s589_s14 = sphi %s622_s14, %s18_s14   ;;  %s585_s13 = sphi %s620_s13, %s806_s13   ;;  %s581_s12 = sphi %s618_s12, %s805_s12   ;;  %s577_s11 = sphi %s616_s11, %s804_s11   ;;  %s573_s10 = sphi %s614_s10, %s803_s10   ;;  %s569_s9 = sphi %s612_s9, %s802_s9  }
   0x7   : > { %s30_s17 = sadd.s32 1, %s585_s13  ;;  %s60_s18 = sadd.s32 1, %s577_s11 }
   0x8   : > { %p32_p0 = scmp.ge.s32.totalorder %s30_s17, 2  ;;  %p67_p1 = scmp.ne.s32.totalorder %s577_s11, %s573_s10 }
   0x9   : > { %p68_p2 = scmp.eq.s32.totalorder %s589_s14, 0  ;;  %p73_p3 = scmp.ne.s32.totalorder %s573_s10, %s569_s9 }
   0xa   : > { %s808_s17 = smov (%p32_p0, %s30_s17), 0  ;;  %p74_p5 = scmp.eq.s32.totalorder %s389_s15, 0 }
   0xb   : > { %p653_p4 = por %p68_p2, %p67_p1  ;;  %s55_s20 = ssub.s32 %s585_s13, %s808_s17 }
   0xc   : > { %p99_p6 = scmp.eq.s32.totalorder %s389_s15, 1  ;;  %p58_p7 = scmp.eq.s32.totalorder %s55_s20, 0 }
   0xd   : > { %p659_p8 = por %p74_p5, %p73_p3  ;;  %p105_p10 = scmp.eq.s32.totalorder %s390_s16, 1 }
   0xe   : > { %p663_p9 = por %p99_p6, %p67_p1  ;;  %p418_p13 = scmp.lt.s32.totalorder %s589_s14, 2 }
   0xf   : > { %s668_s23 = scalar_select %p58_p7, %s577_s11, %s60_s18  }
  0x10   : > { %s794_s22 = scalar_select %p663_p9, 1, 0 }
  0x11   : > { %p670_p11 = por %p105_p10, %p73_p3  ;;  %s128_s25 = sand.u32 1, %s577_s11  }
  0x12   : > { %s393_s26 = sshll.u32 %s128_s25, 3  ;;  %s404_s27 = sshll.u32 %s585_s13, 7 }
  0x13   : > { %s795_s24 = scalar_select %p670_p11, 1, 0 }
  0x14   : > { %s681_s30 = scalar_lea.hbm %s789_s1, %s404_s27  ;;  %s132_s3 = scalar_lea.vmem [#allocation2], %s393_s26 }
  0x15   : > { %s142_s4 = sshll.u32 %s132_s3, 4  ;;  %p687_p0 = pnand %p418_p13, %p653_p4  ;;  %s683_s4 = int_to_ptr.vmem [resolvable:$true] %s142_s4 }
  0x16   : > { %s129_s6 = scalar_lea.sflag [#allocation3], %s128_s25  ;;  %s477_s7 = scalar_lea.hbm %s681_s30, 128 }
  0x17   : > { %p478_p3 = scmp.ne.s32.totalorder %s681_s30, %s477_s7  ;;  %p479_p5 = pneg %p687_p0 }
  0x18   : > { %s482_s16 = scalar_lea.hbm %s789_s1, 256  ;;  %p483_p4 = scmp.lt.u32.totalorder %s681_s30, %s789_s1 }
  0x19   : > { %p480_p6 = pnand %p479_p5, %p478_p3  ;;  %p484_p10 = scmp.lt.u32.totalorder %s482_s16, %s477_s7 }
  0x1a   : > { %p486_p12 = scmp.lt.u32.totalorder %s477_s7, %s681_s30 }
  0x1b   : > { %p481_p7 = pneg %p480_p6  ;;  %p485_p13 = por %p484_p10, %p483_p4 }
  0x1d   : > { %p487_p1 = por %p486_p12, %p485_p13 }
  0x1f   : > { %p488_p2 = pnand %p487_p1, %p481_p7 }
  0x21   : > { %491 = shalt.err (!%p488_p2)
}
  0x22   : > { %s492_s20 = scalar_lea.vmem %s683_s4, 128  ;;  %s591_s25 = smov [#allocation2]  }
  0x23   : > { %p493_p3 = scmp.ne.s32.totalorder %s683_s4, %s492_s20  ;;  %s497_s26 = sshll.u32 %s591_s25, 4  ;;  %s498_s26 = int_to_ptr.vmem [resolvable:$false] %s497_s26 }
  0x24   : > { %s499_s27 = scalar_lea.vmem %s498_s26, 256  ;;  %p500_p9 = scmp.lt.s32.totalorder %s683_s4, %s498_s26 }
  0x25   : > { %p495_p6 = pnand %p493_p3, %p479_p5  ;;  %p501_p4 = scmp.lt.s32.totalorder %s499_s27, %s492_s20 }
  0x27   : > { %p496_p11 = pneg %p495_p6  ;;  %p502_p10 = por %p501_p4, %p500_p9 }
  0x29   : > { %p503_p12 = pnand %p502_p10, %p496_p11 }
  0x2b   : > { %506 = shalt.err (!%p503_p12)
}
  0x2c   : > { %413 = dma.hbm_to_vmem [thread:$0]  (!%p687_p0), %s681_s30, 128, %s683_s4, %s129_s6  }
  0x2d   : > { %p797_p1 = scmp.lt.s32.totalorder %s589_s14, 3  ;;  %p798_p2 = scmp.ge.s32.totalorder %s589_s14, 1 }
  0x2f   : > { %p148_p5 = pnand %p798_p2, %p797_p1 }
  0x30   : > { %s723_s28 = sand.u32 (!%p148_p5), 1, %s573_s10  }
  0x31   : > { %151 = sbr.rel (%p148_p5) target bundleno = 214 (0xd6), region = 28  ;;  %s397_s29 = sshll.u32 (!%p148_p5), %s723_s28, 3 }
  0x32   : > { %s154_s3 = scalar_lea.sflag (!%p148_p5), [#allocation3], %s723_s28  ;;  %s157_s7 = scalar_lea.vmem (!%p148_p5), [#allocation2], %s397_s29 }
  0x38   : > { %560 = dma.done.wait (%p659_p8), %s154_s3, 128  }
  0x39   : > { %562 = vsyncadd (%p659_p8), %s154_s3, 4294967168  ;;  %v592_v0 = vmov 0   ;;  %v593_v1 = vmov 2   ;;  %v181_v2 = vld [vmem:[%s788_s0] sm:$0xff]  ;;  %v594_v3 = vmov 1   ;;  %v595_v4 = vmov 3  }
  0x3a   : > { %472 = vset.pattern.permute.xlu0 %v592_v0  ;;  %474 = vset.pattern.permute.xlu1 %v593_v1  ;;  %v188_v5 = vlaneseq  ;;  %v180_v11 = vld [vmem:[%s157_s7] sm:$0xff]  ;;  %s398_s21 = sshll.u32 %s723_s28, 4  ;;  %s405_s5 = sshll.u32 %s581_s12, 8 }
  0x3b   : > { %184 = vperm.xlu0 %472, %v181_v2   ;;  %235 = vperm.xlu1 %474, %v181_v2   ;;  %s177_s6 = scalar_lea.vmem [#allocation5], %s398_s21  ;;  %s739_s18 = scalar_lea.hbm %s790_s2, %s405_s5 }
  0x3c   : > { %v189_v6 = vshrl.u32 %v188_v5, 7  ;;  %s305_s8 = sshll.u32 %s177_s6, 4  ;;  %s289_s19 = scalar_lea.sflag [#allocation4], %s723_s28  ;;  %s741_s8 = int_to_ptr.vmem [resolvable:$true] %s305_s8 }
  0x3d   : > { %s507_s12 = scalar_lea.vmem %s741_s8, 256  ;;  %p799_p9 = scmp.ne.s32.totalorder %s794_s22, 0 }
  0x3e   : > { %v190_v7 = vsub.s32 0, %v189_v6  ;;  %v194_v8 = vsub.s32 4, %v189_v6  ;;  %v214_v9 = vsub.s32 1, %v189_v6  ;;  %v218_v10 = vsub.s32 5, %v189_v6  ;;  %p508_p8 = scmp.ne.s32.totalorder %s741_s8, %s507_s12  ;;  %s596_s20 = smov [#allocation5]  }
  0x3f   : > { %473 = vset.pattern.permute.xlu0 %v594_v3  ;;  %475 = vset.pattern.permute.xlu1 %v595_v4  ;;  %v240_v12 = vsub.s32 2, %v189_v6  ;;  %v244_v13 = vsub.s32 6, %v189_v6  ;;  %v266_v14 = vsub.s32 3, %v189_v6  ;;  %v270_v15 = vsub.s32 7, %v189_v6  ;;  %s511_s25 = sshll.u32 %s596_s20, 4  ;;  %s512_s25 = int_to_ptr.vmem [resolvable:$false] %s511_s25 }
  0x40   : > { %209 = vperm.xlu0 %473, %v181_v2   ;;  %261 = vperm.xlu1 %475, %v181_v2   ;;  %v191_v16 = vrot.slane %v180_v11, %v190_v7  ;;  %v195_v17 = vrot.slane %v180_v11, %v194_v8  ;;  %v215_v18 = vrot.slane %v180_v11, %v214_v9  ;;  %p509_p11 = pnand %p508_p8, %p799_p9  ;;  %s513_s26 = scalar_lea.vmem %s512_s25, 512 }
  0x41   : > { %v219_v19 = vrot.slane %v180_v11, %v218_v10  ;;  %v241_v20 = vrot.slane %v180_v11, %v240_v12  ;;  %v245_v21 = vrot.slane %v180_v11, %v244_v13  ;;  %v267_v24 = vrot.slane %v180_v11, %v266_v14  ;;  %p514_p7 = scmp.lt.s32.totalorder %s741_s8, %s512_s25  ;;  %p515_p13 = scmp.lt.s32.totalorder %s513_s26, %s507_s12 }
  0x42   : > { %v271_v25 = vrot.slane %v180_v11, %v270_v15  ;;  %v201_v26 = vrot.slane %v191_v16, %v190_v7  ;;  %v205_v27 = vrot.slane %v195_v17, %v190_v7  ;;  %v225_v28 = vrot.slane %v215_v18, %v214_v9  ;;  %p510_p0 = pneg %p509_p11 }
  0x43   : > { %v229_v29 = vrot.slane %v219_v19, %v214_v9  ;;  %v251_v30 = vrot.slane %v241_v20, %v240_v12  ;;  %v255_v31 = vrot.slane %v245_v21, %v240_v12  ;;  %v277_v32 = vrot.slane %v267_v24, %v266_v14  ;;  %p516_p3 = por %p515_p13, %p514_p7 }
  0x44   : > { %476 = vset.pattern.permute.xlu0 %v595_v4  ;;  %v281_v33 = vrot.slane %v271_v25, %v266_v14 }
  0x45   : > { %p517_p6 = pnand %p516_p3, %p510_p0 }
  0xba   : > { %v185_v22 = vpop.permute.xlu0 %184  ;;  %v236_v23 = vpop.permute.xlu1 %235 }
  0xbb   : > { %v206_v36 = vmul.f32 %v201_v26, %v185_v22  ;;  %v207_v37 = vmul.f32 %v205_v27, %v185_v22  ;;  %v256_v40 = vmul.f32 %v251_v30, %v236_v23  ;;  %v257_v41 = vmul.f32 %v255_v31, %v236_v23 }
  0xbf   : > { %v210_v34 = vpop.permute.xlu0 %209  ;;  %v262_v35 = vpop.permute.xlu1 %261 }
  0xc0   : > { %v230_v38 = vmul.f32 %v225_v28, %v210_v34  ;;  %v231_v39 = vmul.f32 %v229_v29, %v210_v34  ;;  %v282_v44 = vmul.f32 %v277_v32, %v262_v35  ;;  %v283_v45 = vmul.f32 %v281_v33, %v262_v35 }
  0xc2   : > { %v232_v42 = vadd.f32 %v230_v38, %v206_v36  ;;  %v233_v43 = vadd.f32 %v231_v39, %v207_v37 }
  0xc4   : > { %v258_v46 = vadd.f32 %v256_v40, %v232_v42  ;;  %v259_v47 = vadd.f32 %v257_v41, %v233_v43 }
  0xc6   : > { %v284_v48 = vadd.f32 %v282_v44, %v258_v46  ;;  %v285_v49 = vadd.f32 %v283_v45, %v259_v47 }
  0xc8   : > { %286 = vst [vmem:[%s177_s6] sm:$0xff] %v284_v48  ;;  %287 = vst [vmem:[%s177_s6 + $0x8] sm:$0xff] %v285_v49 }
  0xc9   : > { %520 = shalt.err (!%p517_p6)
}
  0xca   : > { %s521_s27 = scalar_lea.hbm %s739_s18, 256  ;;  %s525_s3 = scalar_lea.hbm %s790_s2, 512 }
  0xcb   : > { %p522_p4 = scmp.ne.s32.totalorder %s739_s18, %s521_s27  ;;  %p526_p1 = scmp.lt.u32.totalorder %s739_s18, %s790_s2 }
  0xcc   : > { %p527_p2 = scmp.lt.u32.totalorder %s525_s3, %s521_s27  ;;  %p529_p8 = scmp.lt.u32.totalorder %s521_s27, %s739_s18 }
  0xcd   : > { %p523_p10 = pnand %p522_p4, %p799_p9 }
  0xce   : > { %p528_p5 = por %p527_p2, %p526_p1 }
  0xcf   : > { %p524_p12 = pneg %p523_p10 }
  0xd0   : > { %p530_p11 = por %p529_p8, %p528_p5 }
  0xd2   : > { %p531_p0 = pnand %p530_p11, %p524_p12 }
  0xd4   : > { %534 = shalt.err (!%p531_p0)
}
  0xd5   : > { %408 = dma.vmem_to_hbm [thread:$0]  (%p799_p9), %s741_s8, 256, %s739_s18, %s289_s19  }
  0xd6 PF: > { %s317_s4 = sand.u32 1, %s569_s9   ;;  %p800_p7 = scmp.ne.s32.totalorder %s795_s24, 0 }
  0xd7   : > { %p801_p13 = scmp.ge.s32.totalorder %s589_s14, 2  ;;  %s318_s21 = scalar_lea.sflag [#allocation4], %s317_s4 }
  0xd9   : > { %p415_p3 = pnand %p801_p13, %p800_p7 }
  0xdb   : > { %564 = dma.done.wait (!%p415_p3), %s318_s21, 256  }
  0xdc   : > { %566 = vsyncadd (!%p415_p3), %s318_s21, 4294967040  ;;  %s18_s14 = sadd.s32 1, %s589_s14   ;;  %s802_s9 = smov %s573_s10 }
  0xdd   : > { %p15_p6 = scmp.ge.s32.totalorder %s18_s14, 4   ;;  %s803_s10 = smov %s577_s11 }
  0xde   : > { %s804_s11 = smov %s668_s23  ;;  %s805_s12 = smov %s585_s13 }
  0xdf   : > { %s806_s13 = smov %s808_s17  ;;  %17 = sbr.rel (!%p15_p6) target bundleno = 6 (0x6), region = 73 }
  0xe6   :  { %323 = vsyncpa [#allocation3], 1 }
  0xe7   :  { %325 = vsyncpa [#allocation3 + $0x1], 1 }
  0xe8   :  { %326 = vsyncpa [#allocation4], 1 }
  0xe9   :  { %328 = vsyncpa [#allocation4 + $0x1], 1 }

</bundles_post_ra>
